<compile_context>
chip_gen: v5e
topology: v5e:2x2
jax: 0.10.0
libtpu: 0.0.40
codegen_flags: <defaults>
</compile_context>

<pallas_src>
import jax
import jax.numpy as jnp
from jax.experimental import pallas as pl
from jax.experimental.pallas import tpu as pltpu


def _round_up(n, m):
    return ((n + m - 1) // m) * m


def _pick_tile(total, unit, cap):
    """Largest multiple of `unit` that divides `total` (a multiple of `unit`) and is <= cap."""
    best = unit
    t = unit
    limit = min(cap, total)
    while t <= limit:
        if total % t == 0:
            best = t
        t += unit
    return best


def drown_classifier_kernel(x_ref, wf_ref, b1_ref, w2_ref, b2_ref, o_ref, acc_ref):
    k = pl.program_id(1)

    @pl.when(k == 0)
    def _():
        acc_ref[...] = jnp.zeros_like(acc_ref)

    # Folded backbone + classifier[0] (Linear(128,32)): cast the streamed f32 tile to
    # bf16 in-register (hidden under the input DMA) and accumulate in f32 on the MXU.
    acc_ref[...] += jnp.dot(
        x_ref[...].astype(jnp.bfloat16), wf_ref[...],
        preferred_element_type=jnp.float32,
    )

    @pl.when(k == pl.num_programs(1) - 1)
    def _():
        # classifier[1]: bias + ReLU in f32; classifier[2]: Dropout(0.3) -> identity (eval).
        h = jnp.maximum(acc_ref[...] + b1_ref[...], 0.0)
        # classifier[3]: Linear(32, 1) — tiny head, kept in f32.
        logits = jnp.dot(h, w2_ref[...], preferred_element_type=jnp.float32) + b2_ref[...]
        # classifier[4]: Sigmoid via EUP exp + approximate reciprocal (free bundle slots).
        o_ref[...] = pl.reciprocal(1.0 + jnp.exp(-logits), approx=True)


def drown_classifier_forward(x, wb, w1, b1, w2, b2, *, tb_cap=512, tk_cap=2048):
    """x: [B, C, H, W] float32 (NCHW). Returns sigmoid probs, squeezed like PyTorch ([B])."""
    B = x.shape[0]
    x_flat = x.reshape(B, -1).astype(jnp.float32)
    D = x_flat.shape[1]

    # Fold the frozen linear backbone into the first classifier layer:
    #   (x @ wb) @ w1 == x @ (wb @ w1)   — valid, no nonlinearity in between.
    w_fused = jnp.dot(wb.astype(jnp.float32), w1.astype(jnp.float32)).astype(jnp.bfloat16)

    b1 = b1.reshape(1, -1).astype(jnp.float32)   # (1, 32)
    w2 = w2.reshape(-1, 1).astype(jnp.float32)   # (32, 1)
    b2 = b2.reshape(1, 1).astype(jnp.float32)    # (1, 1)
    nh = w_fused.shape[1]                        # 32

    # Tile selection: divisors of the (8,128)-rounded dims, so aligned shapes need no pad.
    B_pad = _round_up(B, 8)
    D_pad = _round_up(D, 128)
    tb = _pick_tile(B_pad, 8, tb_cap)
    tk = _pick_tile(D_pad, 128, tk_cap)
    gb, gk = B_pad // tb, D_pad // tk

    if (B_pad != B) or (D_pad != D):
        # Zero padding contributes nothing to the dot products; only hit for ragged dims.
        x_flat = jnp.pad(x_flat, ((0, B_pad - B), (0, D_pad - D)))
    if D_pad != D:
        w_fused = jnp.pad(w_fused, ((0, D_pad - D), (0, 0)))

    cost = pl.CostEstimate(
        flops=2 * B_pad * D_pad * nh + 2 * B_pad * nh,
        transcendentals=B_pad,
        bytes_accessed=B_pad * D_pad * 4 + gb * D_pad * nh * 2
        + B_pad * 4 + (2 * nh + 2) * 4,
    )

    out = pl.pallas_call(
        drown_classifier_kernel,
        out_shape=jax.ShapeDtypeStruct((B_pad, 1), jnp.float32),
        grid_spec=pltpu.PrefetchScalarGridSpec(
            num_scalar_prefetch=0,
            grid=(gb, gk),                                          # reduction axis last
            in_specs=[
                pl.BlockSpec((tb, tk), lambda i, k: (i, k)),        # x tile (f32)
                pl.BlockSpec((tk, nh), lambda i, k: (k, 0)),        # fused weight tile (bf16)
                pl.BlockSpec((1, nh), lambda i, k: (0, 0)),         # b1 (resident)
                pl.BlockSpec((nh, 1), lambda i, k: (0, 0)),         # w2 (resident)
                pl.BlockSpec((1, 1), lambda i, k: (0, 0)),          # b2 (resident)
            ],
            out_specs=pl.BlockSpec((tb, 1), lambda i, k: (i, 0)),
            scratch_shapes=[pltpu.VMEM((tb, nh), jnp.float32)],
        ),
        compiler_params=pltpu.CompilerParams(
            dimension_semantics=("parallel", "arbitrary"),
            vmem_limit_bytes=32 * 1024 * 1024,
        ),
        cost_estimate=cost,
    )(x_flat, w_fused, b1, w2, b2)

    # PyTorch `output.squeeze()` semantics (returns a 0-d scalar when B == 1).
    return jnp.squeeze(out[:B, :])


def _reference_forward(x, wb, w1, b1, w2, b2):
    B = x.shape[0]
    feats = x.reshape(B, -1) @ wb
    h = jnp.maximum(feats @ w1 + b1.reshape(1, -1), 0.0)
    return jnp.squeeze(jax.nn.sigmoid(h @ w2.reshape(-1, 1) + b2.reshape(1, 1)))


if __name__ == "__main__":
    key = jax.random.PRNGKey(0)
    k_x, k_wb, k_w1, k_b1, k_w2, k_b2 = jax.random.split(key, 6)

    # Small shapes consistent with the forward: image-like input, 128-d features.
    B, C, H, W = 8, 4, 16, 16
    D = C * H * W  # 1024

    x = jax.random.normal(k_x, (B, C, H, W), dtype=jnp.float32)

    wb = jax.random.normal(k_wb, (D, 128), dtype=jnp.float32) * 0.02   # frozen backbone
    w1 = jax.random.normal(k_w1, (128, 32), dtype=jnp.float32) * 0.1
    b1 = jax.random.normal(k_b1, (1, 32), dtype=jnp.float32) * 0.1
    w2 = jax.random.normal(k_w2, (32, 1), dtype=jnp.float32) * 0.1
    b2 = jax.random.normal(k_b2, (1, 1), dtype=jnp.float32) * 0.1

    out = jax.block_until_ready(drown_classifier_forward(x, wb, w1, b1, w2, b2))
    ref = jax.block_until_ready(_reference_forward(x, wb, w1, b1, w2, b2))

    assert out.shape == (B,), out.shape
    # bf16 MXU inputs + folded weights + approx reciprocal => loose-ish tolerance.
    assert jnp.allclose(out, ref, atol=2e-2, rtol=2e-2), (out, ref)

    print("KERNEL_OK")
</pallas_src>

<mosaic_0001>
module attributes {stable_mosaic.version = 11 : i64} {
  func.func @drown_classifier_kernel(%arg0: i32, %arg1: i32, %arg2: memref<8x1024xf32, #tpu.memory_space<vmem>>, %arg3: memref<1024x32xbf16, #tpu.memory_space<vmem>>, %arg4: memref<1x32xf32, #tpu.memory_space<vmem>>, %arg5: memref<32x1xf32, #tpu.memory_space<vmem>>, %arg6: memref<1x1xf32, #tpu.memory_space<vmem>>, %arg7: memref<8x1xf32, #tpu.memory_space<vmem>>, %arg8: memref<8x32xf32, #tpu.memory_space<vmem>>) attributes {dimension_semantics = [#tpu.dimension_semantics<parallel>, #tpu.dimension_semantics<arbitrary>], iteration_bounds = array<i64: 1, 1>, scalar_prefetch = 0 : i64, scratch_operands = 1 : i64, tpu.core_type = #tpu.core_type<tc>, window_params = [{transform_indices = @transform_0, window_bounds = array<i64: 8, 1024>}, {transform_indices = @transform_1, window_bounds = array<i64: 1024, 32>}, {pipeline_mode = #tpu.pipeline_mode<synchronous>, transform_indices = @transform_2, window_bounds = array<i64: 1, 32>}, {pipeline_mode = #tpu.pipeline_mode<synchronous>, transform_indices = @transform_3, window_bounds = array<i64: 32, 1>}, {pipeline_mode = #tpu.pipeline_mode<synchronous>, transform_indices = @transform_4, window_bounds = array<i64: 1, 1>}, {transform_indices = @transform_5, window_bounds = array<i64: 8, 1>}]} {
    %c0_i32 = arith.constant 0 : i32
    %0 = arith.cmpi eq, %arg1, %c0_i32 : i32
    %1 = arith.extui %0 : i1 to i32
    %c0_i32_0 = arith.constant 0 : i32
    %2 = arith.cmpi ne, %1, %c0_i32_0 : i32
    scf.if %2 {
      %cst_10 = arith.constant 0.000000e+00 : f32
      %13 = vector.broadcast %cst_10 : f32 to vector<8x32xf32>
      %c0_11 = arith.constant 0 : index
      %c0_12 = arith.constant 0 : index
      %14 = vector.load %arg8[%c0_11, %c0_12] : memref<8x32xf32, #tpu.memory_space<vmem>>, vector<8x32xf32>
      tpu.vector_store %arg8[%c0_11, %c0_12], %13 {strides = array<i32>} : memref<8x32xf32, #tpu.memory_space<vmem>>, vector<8x32xf32>,
    } else {
    }
    %c0 = arith.constant 0 : index
    %c0_1 = arith.constant 0 : index
    %3 = vector.load %arg8[%c0, %c0_1] : memref<8x32xf32, #tpu.memory_space<vmem>>, vector<8x32xf32>
    %c0_2 = arith.constant 0 : index
    %c0_3 = arith.constant 0 : index
    %4 = vector.load %arg2[%c0_2, %c0_3] : memref<8x1024xf32, #tpu.memory_space<vmem>>, vector<8x1024xf32>
    %5 = arith.truncf %4 : vector<8x1024xf32> to vector<8x1024xbf16>
    %c0_4 = arith.constant 0 : index
    %c0_5 = arith.constant 0 : index
    %6 = vector.load %arg3[%c0_4, %c0_5] : memref<1024x32xbf16, #tpu.memory_space<vmem>>, vector<1024x32xbf16>
    %cst = arith.constant dense<0.000000e+00> : vector<8x32xf32>
    %7 = tpu.matmul %5, %6, %cst {dimension_numbers = #tpu.dot_dimension_numbers<[1], [0], [0], [1], [0, 0, 1, 1], [], []>} : vector<8x1024xbf16>, vector<1024x32xbf16>, vector<8x32xf32> -> vector<8x32xf32>
    %8 = arith.addf %3, %7 : vector<8x32xf32>
    %c0_6 = arith.constant 0 : index
    %c0_7 = arith.constant 0 : index
    %9 = vector.load %arg8[%c0_6, %c0_7] : memref<8x32xf32, #tpu.memory_space<vmem>>, vector<8x32xf32>
    tpu.vector_store %arg8[%c0_6, %c0_7], %8 {strides = array<i32>} : memref<8x32xf32, #tpu.memory_space<vmem>>, vector<8x32xf32>,
    %c0_i32_8 = arith.constant 0 : i32
    %10 = arith.cmpi eq, %arg1, %c0_i32_8 : i32
    %11 = arith.extui %10 : i1 to i32
    %c0_i32_9 = arith.constant 0 : i32
    %12 = arith.cmpi ne, %11, %c0_i32_9 : i32
    scf.if %12 {
      %c0_10 = arith.constant 0 : index
      %c0_11 = arith.constant 0 : index
      %13 = vector.load %arg8[%c0_10, %c0_11] : memref<8x32xf32, #tpu.memory_space<vmem>>, vector<8x32xf32>
      %c0_12 = arith.constant 0 : index
      %c0_13 = arith.constant 0 : index
      %14 = vector.load %arg4[%c0_12, %c0_13] : memref<1x32xf32, #tpu.memory_space<vmem>>, vector<1x32xf32>
      %15 = vector.broadcast %14 : vector<1x32xf32> to vector<8x32xf32>
      %16 = arith.addf %13, %15 : vector<8x32xf32>
      %cst_14 = arith.constant 0.000000e+00 : f32
      %17 = vector.broadcast %cst_14 : f32 to vector<8x32xf32>
      %18 = arith.maximumf %16, %17 : vector<8x32xf32>
      %c0_15 = arith.constant 0 : index
      %c0_16 = arith.constant 0 : index
      %19 = vector.load %arg5[%c0_15, %c0_16] : memref<32x1xf32, #tpu.memory_space<vmem>>, vector<32x1xf32>
      %cst_17 = arith.constant dense<0.000000e+00> : vector<8x1xf32>
      %20 = tpu.matmul %18, %19, %cst_17 {dimension_numbers = #tpu.dot_dimension_numbers<[1], [0], [0], [1], [0, 0, 1, 1], [], []>} : vector<8x32xf32>, vector<32x1xf32>, vector<8x1xf32> -> vector<8x1xf32>
      %c0_18 = arith.constant 0 : index
      %c0_19 = arith.constant 0 : index
      %21 = vector.load %arg6[%c0_18, %c0_19] : memref<1x1xf32, #tpu.memory_space<vmem>>, vector<1x1xf32>
      %22 = vector.broadcast %21 : vector<1x1xf32> to vector<8x1xf32>
      %23 = arith.addf %20, %22 : vector<8x1xf32>
      %cst_20 = arith.constant 0.000000e+00 : f32
      %24 = vector.broadcast %cst_20 : f32 to vector<8x1xf32>
      %25 = arith.subf %24, %23 : vector<8x1xf32>
      %26 = math.exp %25 : vector<8x1xf32>
      %cst_21 = arith.constant 1.000000e+00 : f32
      %27 = vector.broadcast %cst_21 : f32 to vector<8x1xf32>
      %28 = arith.addf %27, %26 : vector<8x1xf32>
      %29 = tpu.reciprocal %28 {approx = true} : vector<8x1xf32> -> vector<8x1xf32>
      %c0_22 = arith.constant 0 : index
      %c0_23 = arith.constant 0 : index
      %30 = vector.load %arg7[%c0_22, %c0_23] : memref<8x1xf32, #tpu.memory_space<vmem>>, vector<8x1xf32>
      tpu.vector_store %arg7[%c0_22, %c0_23], %29 {strides = array<i32>} : memref<8x1xf32, #tpu.memory_space<vmem>>, vector<8x1xf32>,
    } else {
    }
    return
  }
  func.func @transform_0(%arg0: i32, %arg1: i32) -> (i32, i32) {
    %c0_i32 = arith.constant 0 : i32
    return %arg0, %arg1 : i32, i32
  }
  func.func @transform_1(%arg0: i32, %arg1: i32) -> (i32, i32) {
    %c0_i32 = arith.constant 0 : i32
    %c0_i32_0 = arith.constant 0 : i32
    return %arg1, %c0_i32 : i32, i32
  }
  func.func @transform_2(%arg0: i32, %arg1: i32) -> (i32, i32) {
    %c0_i32 = arith.constant 0 : i32
    %c0_i32_0 = arith.constant 0 : i32
    %c0_i32_1 = arith.constant 0 : i32
    return %c0_i32, %c0_i32_0 : i32, i32
  }
  func.func @transform_3(%arg0: i32, %arg1: i32) -> (i32, i32) {
    %c0_i32 = arith.constant 0 : i32
    %c0_i32_0 = arith.constant 0 : i32
    %c0_i32_1 = arith.constant 0 : i32
    return %c0_i32, %c0_i32_0 : i32, i32
  }
  func.func @transform_4(%arg0: i32, %arg1: i32) -> (i32, i32) {
    %c0_i32 = arith.constant 0 : i32
    %c0_i32_0 = arith.constant 0 : i32
    %c0_i32_1 = arith.constant 0 : i32
    return %c0_i32, %c0_i32_0 : i32, i32
  }
  func.func @transform_5(%arg0: i32, %arg1: i32) -> (i32, i32) {
    %c0_i32 = arith.constant 0 : i32
    %c0_i32_0 = arith.constant 0 : i32
    return %arg0, %c0_i32 : i32, i32
  }
}

</mosaic_0001>

<bundles_post_ra>
// kernel: tpu_custom_call.1
= control target key start
LH: loop header
LB: loop body
LE: loop exit
PB: predicated region body
PF: predicated region fallthrough
CT: control target
= control target key end

     0   :  { %vm26_vm0 = vcmask 261120   ;;  %vm710_vm1 = vcmask 7168   ;;  %s1315_s1 = inlined_call_operand.vmem [shape: bf16[1024,32], index: 1, kind: input, shape index: {}]   ;;  %s1316_s0 = inlined_call_operand.vmem [shape: f32[8,1024], index: 0, kind: input, shape index: {}]   ;;  %s1317_s2 = inlined_call_operand.vmem [shape: f32[1,32], index: 2, kind: input, shape index: {}]   ;;  %s1318_s3 = inlined_call_operand.vmem [shape: f32[32,1], index: 3, kind: input, shape index: {}]   ;;  %s1319_s4 = inlined_call_operand.<no memory space> [shape: f32[1,1], index: 4, kind: input, shape index: {}]   ;;  %s1320_s5 = inlined_call_operand.vmem [shape: f32[8,1], index: 5, kind: output, shape index: {}]  }
   0x1   :  { %v980_v0 = vld [vmem:[%s1315_s1 + $0x38] sm:$0xff]  ;;  %v979_v4 = vld [vmem:[%s1315_s1 + $0x30] sm:$0xff]  ;;  %v978_v8 = vld [vmem:[%s1315_s1 + $0x28] sm:$0xff] }
   0x2   :  { %v988_v1 = vld [vmem:[%s1315_s1 + $0x78] sm:$0xff]  ;;  %557 = vmatpush.bf16.msra.mxu0 %v980_v0  ;;  %v987_v5 = vld [vmem:[%s1315_s1 + $0x70] sm:$0xff]  ;;  %v986_v9 = vld [vmem:[%s1315_s1 + $0x68] sm:$0xff] }
   0x3   :  { %v996_v2 = vld [vmem:[%s1315_s1 + $0xb8] sm:$0xff]  ;;  %570 = vmatpush.bf16.msra.mxu1 %v988_v1  ;;  %v995_v6 = vld [vmem:[%s1315_s1 + $0xb0] sm:$0xff]  ;;  %v994_v10 = vld [vmem:[%s1315_s1 + $0xa8] sm:$0xff] }
   0x4   :  { %v1004_v3 = vld [vmem:[%s1315_s1 + $0xf8] sm:$0xff]  ;;  %583 = vmatpush.bf16.msra.mxu2 %v996_v2  ;;  %v1003_v7 = vld [vmem:[%s1315_s1 + $0xf0] sm:$0xff]  ;;  %v1002_v11 = vld [vmem:[%s1315_s1 + $0xe8] sm:$0xff] }
   0x5   :  { %596 = vmatpush.bf16.msra.mxu3 %v1004_v3  ;;  %v977_v12 = vld [vmem:[%s1315_s1 + $0x20] sm:$0xff]  ;;  %v976_v16 = vld [vmem:[%s1315_s1 + $0x18] sm:$0xff]  ;;  %v975_v20 = vld [vmem:[%s1315_s1 + $0x10] sm:$0xff] }
   0x6   :  { %558 = vmatpush.bf16.msra.mxu0 %v979_v4  ;;  %v985_v13 = vld [vmem:[%s1315_s1 + $0x60] sm:$0xff]  ;;  %v984_v17 = vld [vmem:[%s1315_s1 + $0x58] sm:$0xff]  ;;  %v983_v21 = vld [vmem:[%s1315_s1 + $0x50] sm:$0xff] }
   0x7   :  { %571 = vmatpush.bf16.msra.mxu1 %v987_v5  ;;  %v993_v14 = vld [vmem:[%s1315_s1 + $0xa0] sm:$0xff]  ;;  %v992_v18 = vld [vmem:[%s1315_s1 + $0x98] sm:$0xff]  ;;  %v991_v22 = vld [vmem:[%s1315_s1 + $0x90] sm:$0xff] }
   0x8   :  { %584 = vmatpush.bf16.msra.mxu2 %v995_v6  ;;  %v1001_v15 = vld [vmem:[%s1315_s1 + $0xe0] sm:$0xff]  ;;  %v1000_v19 = vld [vmem:[%s1315_s1 + $0xd8] sm:$0xff]  ;;  %v999_v23 = vld [vmem:[%s1315_s1 + $0xd0] sm:$0xff] }
   0x9   :  { %597 = vmatpush.bf16.msra.mxu3 %v1003_v7  ;;  %v974_v24 = vld [vmem:[%s1315_s1 + $0x8] sm:$0xff]  ;;  %v973_v28 = vld [vmem:[%s1315_s1] sm:$0xff]  ;;  %v1012_v32 = vld [vmem:[%s1315_s1 + $0x138] sm:$0xff] }
   0xa   :  { %559 = vmatpush.bf16.msra.mxu0 %v978_v8  ;;  %v982_v25 = vld [vmem:[%s1315_s1 + $0x48] sm:$0xff]  ;;  %v981_v29 = vld [vmem:[%s1315_s1 + $0x40] sm:$0xff]  ;;  %v31_v33 = vld [vmem:[%s1316_s0 + $0x10] sm:$0xff] }
   0xb   :  { %572 = vmatpush.bf16.msra.mxu1 %v986_v9  ;;  %v990_v26 = vld [vmem:[%s1315_s1 + $0x88] sm:$0xff]  ;;  %v989_v30 = vld [vmem:[%s1315_s1 + $0x80] sm:$0xff]  ;;  %v1020_v35 = vld [vmem:[%s1315_s1 + $0x178] sm:$0xff]  ;;  %v39_v40 = vpack.c.bf16 %v31_v33, %v31_v33 }
   0xc   :  { %585 = vmatpush.bf16.msra.mxu2 %v994_v10  ;;  %v998_v27 = vld [vmem:[%s1315_s1 + $0xc8] sm:$0xff]  ;;  %v997_v31 = vld [vmem:[%s1315_s1 + $0xc0] sm:$0xff]  ;;  %v32_v36 = vld [vmem:[%s1316_s0 + $0x18] sm:$0xff] }
   0xd   :  { %598 = vmatpush.bf16.msra.mxu3 %v1002_v11  ;;  %v29_v34 = vld [vmem:[%s1316_s0] sm:$0xff]  ;;  %v30_v37 = vld [vmem:[%s1316_s0 + $0x8] sm:$0xff]  ;;  %v1028_v38 = vld [vmem:[%s1315_s1 + $0x1b8] sm:$0xff]  ;;  %v40_v42 = vpack.c.bf16 %v32_v36, %v32_v36 }
   0xe   :  { %560 = vmatpush.bf16.msra.mxu0 %v977_v12  ;;  %v1036_v39 = vld [vmem:[%s1315_s1 + $0x1f8] sm:$0xff]  ;;  %v37_v41 = vpack.c.bf16 %v29_v34, %v29_v34  ;;  %v38_v43 = vpack.c.bf16 %v30_v37, %v30_v37  ;;  %v1011_v44 = vld [vmem:[%s1315_s1 + $0x130] sm:$0xff]  ;;  %v1010_v48 = vld [vmem:[%s1315_s1 + $0x128] sm:$0xff] }
   0xf   :  { %573 = vmatpush.bf16.msra.mxu1 %v985_v13  ;;  %v1019_v45 = vld [vmem:[%s1315_s1 + $0x170] sm:$0xff]  ;;  %v1018_v49 = vld [vmem:[%s1315_s1 + $0x168] sm:$0xff]  ;;  %v1009_v52 = vld [vmem:[%s1315_s1 + $0x120] sm:$0xff] }
  0x10   :  { %586 = vmatpush.bf16.msra.mxu2 %v993_v14  ;;  %v1027_v46 = vld [vmem:[%s1315_s1 + $0x1b0] sm:$0xff]  ;;  %v1026_v50 = vld [vmem:[%s1315_s1 + $0x1a8] sm:$0xff]  ;;  %v1017_v53 = vld [vmem:[%s1315_s1 + $0x160] sm:$0xff] }
  0x11   :  { %599 = vmatpush.bf16.msra.mxu3 %v1001_v15  ;;  %v1035_v47 = vld [vmem:[%s1315_s1 + $0x1f0] sm:$0xff]  ;;  %v1034_v51 = vld [vmem:[%s1315_s1 + $0x1e8] sm:$0xff]  ;;  %v1025_v54 = vld [vmem:[%s1315_s1 + $0x1a0] sm:$0xff] }
  0x12   :  { %561 = vmatpush.bf16.msra.mxu0 %v976_v16  ;;  %v1033_v55 = vld [vmem:[%s1315_s1 + $0x1e0] sm:$0xff]  ;;  %v1008_v56 = vld [vmem:[%s1315_s1 + $0x118] sm:$0xff]  ;;  %v1007_v60 = vld [vmem:[%s1315_s1 + $0x110] sm:$0xff] }
  0x13   :  { %574 = vmatpush.bf16.msra.mxu1 %v984_v17  ;;  %v1016_v57 = vld [vmem:[%s1315_s1 + $0x158] sm:$0xff]  ;;  %v1015_v61 = vld [vmem:[%s1315_s1 + $0x150] sm:$0xff]  ;;  %v1006_v0 = vld [vmem:[%s1315_s1 + $0x108] sm:$0xff] }
  0x14   :  { %587 = vmatpush.bf16.msra.mxu2 %v992_v18  ;;  %v1024_v58 = vld [vmem:[%s1315_s1 + $0x198] sm:$0xff]  ;;  %v1023_v62 = vld [vmem:[%s1315_s1 + $0x190] sm:$0xff]  ;;  %v1014_v1 = vld [vmem:[%s1315_s1 + $0x148] sm:$0xff]  ;;  %v1044_v18 = vmov 0.0  }
  0x15   :  { %600 = vmatpush.bf16.msra.mxu3 %v1000_v19  ;;  %v1032_v59 = vld [vmem:[%s1315_s1 + $0x1d8] sm:$0xff]  ;;  %v1031_v63 = vld [vmem:[%s1315_s1 + $0x1d0] sm:$0xff]  ;;  %v1022_v2 = vld [vmem:[%s1315_s1 + $0x188] sm:$0xff]  ;;  %27 = vst.msk [vmem:[#allocation2] sm:$0xff] %vm26_vm0, %v1044_v18 }
  0x16   :  { %562 = vmatpush.bf16.msra.mxu0 %v975_v20  ;;  %v1030_v3 = vld [vmem:[%s1315_s1 + $0x1c8] sm:$0xff]  ;;  %v1005_v4 = vld [vmem:[%s1315_s1 + $0x100] sm:$0xff]  ;;  %v35_v10 = vld [vmem:[%s1316_s0 + $0x30] sm:$0xff] }
  0x17   :  { %575 = vmatpush.bf16.msra.mxu1 %v983_v21  ;;  %v1013_v5 = vld [vmem:[%s1315_s1 + $0x140] sm:$0xff]  ;;  %v34_v8 = vld [vmem:[%s1316_s0 + $0x28] sm:$0xff]  ;;  %v36_v11 = vld [vmem:[%s1316_s0 + $0x38] sm:$0xff]  ;;  %v43_v14 = vpack.c.bf16 %v35_v10, %v35_v10 }
  0x18   :  { %588 = vmatpush.bf16.msra.mxu2 %v991_v22  ;;  %v1021_v6 = vld [vmem:[%s1315_s1 + $0x180] sm:$0xff]  ;;  %v42_v13 = vpack.c.bf16 %v34_v8, %v34_v8  ;;  %v44_v15 = vpack.c.bf16 %v36_v11, %v36_v11 }
  0x19   :  { %601 = vmatpush.bf16.msra.mxu3 %v999_v23  ;;  %v33_v7 = vld [vmem:[%s1316_s0 + $0x20] sm:$0xff]  ;;  %v677_v23 = vld [vmem:[%s1318_s3 + $0x18] sm:$0xff] }
  0x1a   :  { %563 = vmatpush.bf16.msra.mxu0 %v974_v24  ;;  %v1029_v9 = vld [vmem:[%s1315_s1 + $0x1c0] sm:$0xff]  ;;  %v41_v12 = vpack.c.bf16 %v33_v7, %v33_v7  ;;  %v676_v24 = vld [vmem:[%s1318_s3 + $0x10] sm:$0xff] }
  0x1b   :  { %576 = vmatpush.bf16.msra.mxu1 %v982_v25  ;;  %v675_v25 = vld [vmem:[%s1318_s3 + $0x8] sm:$0xff] }
  0x1c   :  { %589 = vmatpush.bf16.msra.mxu2 %v990_v26 }
  0x1d   :  { %602 = vmatpush.bf16.msra.mxu3 %v998_v27 }
  0x1e   :  { %564 = vmatpush.bf16.msra.mxu0 %v973_v28  ;;  %v674_v28 = vld [vmem:[%s1318_s3] sm:$0xff] }
  0x1f   :  { %577 = vmatpush.bf16.msra.mxu1 %v981_v29 }
  0x20   :  { %590 = vmatpush.bf16.msra.mxu2 %v989_v30  ;;  %v10_v30 = vstv %s1319_s4 }
  0x21   :  { %603 = vmatpush.bf16.msra.mxu3 %v997_v31  ;;  %565 = vmatmul.bf16.vlgmr.msra.gmra.mxu0 %v37_v41  ;;  %11 = vst [vmem:[#allocation3] sm:$0x1] %v10_v30 }
  0x22   :  { %609 = vmatpush.bf16.msrb.mxu0 %v1012_v32  ;;  %578 = vmatmul.bf16.vlgmr.msra.gmra.mxu1 %v38_v43 }
  0x23   :  { %622 = vmatpush.bf16.msrb.mxu1 %v1020_v35  ;;  %591 = vmatmul.bf16.vlgmr.msra.gmra.mxu2 %v39_v40 }
  0x24   :  { %635 = vmatpush.bf16.msrb.mxu2 %v1028_v38  ;;  %604 = vmatmul.bf16.vlgmr.msra.gmra.mxu3 %v40_v42  ;;  %v28_v42 = vld [vmem:[#allocation2] sm:$0xff] }
  0x25   :  { %648 = vmatpush.bf16.msrb.mxu3 %v1036_v39 }
  0x26   :  { %610 = vmatpush.bf16.msrb.mxu0 %v1011_v44 }
  0x27   :  { %623 = vmatpush.bf16.msrb.mxu1 %v1019_v45 }
  0x28   :  { %636 = vmatpush.bf16.msrb.mxu2 %v1027_v46 }
  0x29   :  { %649 = vmatpush.bf16.msrb.mxu3 %v1035_v47  ;;  %v1038_v47 = vld [vmem:[%s1317_s2] ss:$0 sm:$0xff] }
  0x2a   :  { %611 = vmatpush.bf16.msrb.mxu0 %v1010_v48 }
  0x2b   :  { %624 = vmatpush.bf16.msrb.mxu1 %v1018_v49 }
  0x2c   :  { %637 = vmatpush.bf16.msrb.mxu2 %v1026_v50 }
  0x2d   :  { %650 = vmatpush.bf16.msrb.mxu3 %v1034_v51  ;;  %v1039_v51 = vld [vmem:[#allocation3] ss:$0 sm:$0xff] }
  0x2e   :  { %612 = vmatpush.bf16.msrb.mxu0 %v1009_v52 }
  0x2f   :  { %625 = vmatpush.bf16.msrb.mxu1 %v1017_v53 }
  0x30   :  { %638 = vmatpush.bf16.msrb.mxu2 %v1025_v54 }
  0x31   :  { %651 = vmatpush.bf16.msrb.mxu3 %v1033_v55 }
  0x32   :  { %613 = vmatpush.bf16.msrb.mxu0 %v1008_v56 }
  0x33   :  { %626 = vmatpush.bf16.msrb.mxu1 %v1016_v57 }
  0x34   :  { %639 = vmatpush.bf16.msrb.mxu2 %v1024_v58 }
  0x35   :  { %652 = vmatpush.bf16.msrb.mxu3 %v1032_v59 }
  0x36   :  { %614 = vmatpush.bf16.msrb.mxu0 %v1007_v60 }
  0x37   :  { %627 = vmatpush.bf16.msrb.mxu1 %v1015_v61 }
  0x38   :  { %640 = vmatpush.bf16.msrb.mxu2 %v1023_v62 }
  0x39   :  { %653 = vmatpush.bf16.msrb.mxu3 %v1031_v63 }
  0x3a   :  { %615 = vmatpush.bf16.msrb.mxu0 %v1006_v0 }
  0x3b   :  { %628 = vmatpush.bf16.msrb.mxu1 %v1014_v1 }
  0x3c   :  { %641 = vmatpush.bf16.msrb.mxu2 %v1022_v2 }
  0x3d   :  { %654 = vmatpush.bf16.msrb.mxu3 %v1030_v3 }
  0x3e   :  { %616 = vmatpush.bf16.msrb.mxu0 %v1005_v4 }
  0x3f   :  { %629 = vmatpush.bf16.msrb.mxu1 %v1013_v5 }
  0x40   :  { %642 = vmatpush.bf16.msrb.mxu2 %v1021_v6 }
  0x41   :  { %655 = vmatpush.bf16.msrb.mxu3 %v1029_v9  ;;  %617 = vmatmul.bf16.vlgmr.msrb.gmra.mxu0 %v41_v12 }
  0x42   :  { %630 = vmatmul.bf16.vlgmr.msrb.gmra.mxu1 %v42_v13  ;;  %697 = vmatpush.msra.mxu0 %v677_v23 }
  0x43   :  { %643 = vmatmul.bf16.vlgmr.msrb.gmra.mxu2 %v43_v14 }
  0x44   :  { %656 = vmatmul.bf16.vlgmr.msrb.gmra.mxu3 %v44_v15  ;;  %698 = vmatpush.msra.mxu0 %v676_v24 }
  0x46   :  { %699 = vmatpush.msra.mxu0 %v675_v25 }
  0x48   :  { %700 = vmatpush.msra.mxu0 %v674_v28 }
  0x9e   :  { %v566_v16 = vpop.f32.mrf.mxu0 }
  0x9f   :  { %v579_v17 = vpop.f32.mrf.mxu1 }
  0xa0   :  { %v580_v29 = vadd.f32 %v579_v17, %v566_v16 }
  0xa6   :  { %v592_v19 = vpop.f32.mrf.mxu2  ;;  %v568_v21 = vpop.f32.mrf.mxu0 }
  0xa7   :  { %v605_v20 = vpop.f32.mrf.mxu3  ;;  %v581_v22 = vpop.f32.mrf.mxu1  ;;  %v593_v31 = vadd.f32 %v592_v19, %v580_v29 }
  0xa9   :  { %v606_v32 = vadd.f32 %v605_v20, %v593_v31 }
  0xae   :  { %v594_v26 = vpop.f32.mrf.mxu2 }
  0xaf   :  { %v607_v27 = vpop.f32.mrf.mxu3 }
  0xbe   :  { %v618_v33 = vpop.f32.mrf.mxu0 }
  0xbf   :  { %v631_v34 = vpop.f32.mrf.mxu1  ;;  %v619_v35 = vadd.f32 %v618_v33, %v606_v32 }
  0xc1   :  { %v632_v36 = vadd.f32 %v631_v34, %v619_v35 }
  0xc6   :  { %v644_v37 = vpop.f32.mrf.mxu2  ;;  %v620_v40 = vpop.f32.mrf.mxu0 }
  0xc7   :  { %v657_v38 = vpop.f32.mrf.mxu3  ;;  %v645_v39 = vadd.f32 %v644_v37, %v632_v36  ;;  %v633_v41 = vpop.f32.mrf.mxu1 }
  0xc9   :  { %v658_v43 = vadd.f32 %v657_v38, %v645_v39 }
  0xcb   :  { %v661_v44 = vadd.f32 %v658_v43, %v28_v42 }
  0xcd   :  { %663 = vst.msk [vmem:[#allocation2] sm:$0xff] %vm26_vm0, %v661_v44 }
  0xce   :  { %v646_v45 = vpop.f32.mrf.mxu2 }
  0xcf   :  { %v659_v46 = vpop.f32.mrf.mxu3 }
  0xd4   :  { %v667_v48 = vld [vmem:[#allocation2] sm:$0xff] }
  0xd5   :  { %v672_v49 = vadd.f32 %v1038_v47, %v667_v48 }
  0xd7   :  { %v673_v50 = vmax.f32 %v672_v49, 0.0 }
  0xd9   :  { %972 = vmatmul.msk.f32.vlgmr.msra.gmra.mxu0 %vm26_vm0, %v673_v50 }
 0x156   :  { %v702_v52 = vpop.f32.mrf.mxu0 }
 0x157   :  { %v703_v53 = vadd.f32 %v1039_v51, %v702_v52 }
 0x159   :  { %v705_v54 = vsub.f32 0.0, %v703_v53 }
 0x15b   :  { %v706_v55 = vmul.f32 1.442695, %v705_v54 }
 0x15d   :  { %1040 = vpow2.f32 %v706_v55 }
 0x163   :  { %v1041_v56 = vpop.eup %1040 }
 0x164   :  { %v708_v57 = vadd.f32 1.0, %v1041_v56 }
 0x166   :  { %1042 = vrcp.f32 %v708_v57 }
 0x16c   :  { %v1043_v58 = vpop.eup %1042 }
 0x16d   :  { %711 = vst.msk [vmem:[%s1320_s5] sm:$0xff] %vm710_vm1, %v1043_v58 }

</bundles_post_ra>
